<compile_context>
chip_gen: v6e
topology: v6e:2x2x1
jax: 0.10.0
libtpu: 0.0.40
codegen_flags: <defaults>
</compile_context>

<pallas_src>
import functools

import jax
import jax.numpy as jnp
from jax.experimental import pallas as pl
from jax.experimental.pallas import tpu as pltpu


def _round_up(x, m):
    return (x + m - 1) // m * m


def fullycon_kernel(x_ref, wt_ref, b_ref, o_ref):
    # x_ref: (tm, N_in)   wt_ref: (N_in, N_out_pad)   b_ref: (1, N_out_pad)
    # o_ref: (tm, N_out_pad), f32
    x = x_ref[...].astype(wt_ref.dtype)          # in-kernel cast (bf16 MXU inputs)
    y = jnp.dot(x, wt_ref[...], preferred_element_type=jnp.float32)
    o_ref[...] = (y + b_ref[...]).astype(o_ref.dtype)


def prepare_fullycon_params(w, b, param_dtype=jnp.bfloat16):
    """One-time (init-time) parameter prep.

    w: (N_out, N_in) f32, b: (N_out,) f32  ->
      w_t_pad: (N_in, N_out_pad) param_dtype  (transposed, lane-padded, zeros in pad)
      b_pad  : (1, N_out_pad) f32             (zeros in pad)
    """
    n_out, n_in = w.shape
    n_out_pad = _round_up(n_out, 128)
    w_t_pad = jnp.zeros((n_in, n_out_pad), param_dtype)
    w_t_pad = w_t_pad.at[:, :n_out].set(w.T.astype(param_dtype))
    b_pad = jnp.zeros((1, n_out_pad), jnp.float32)
    b_pad = b_pad.at[:, :n_out].set(b.astype(jnp.float32))
    return w_t_pad, b_pad


def _fullycon_matmul(x2d, w_t_pad, b_pad):
    """(M, N_in) @ (N_in, N_out_pad) + b, f32 accumulation. Returns (M, N_out_pad) f32."""
    m, n_in = x2d.shape
    n_in_w, n_out_pad = w_t_pad.shape
    assert n_in == n_in_w, "x must flatten to the linear layer's input size"

    if m <= 256:
        tm, m_pad = m, m                       # one grid step, full-array blocks
    else:
        tm = 256                               # fill MXU rows, tile the batch
        m_pad = _round_up(m, tm)
        if m_pad != m:
            x2d = jnp.zeros((m_pad, n_in), x2d.dtype).at[:m].set(x2d)

    itemsize_w = jnp.dtype(w_t_pad.dtype).itemsize
    cost = pl.CostEstimate(
        flops=2 * m_pad * n_in * n_out_pad,
        transcendentals=0,
        bytes_accessed=(n_in * n_out_pad * itemsize_w
                        + m_pad * n_in * x2d.dtype.itemsize
                        + (m_pad + 1) * n_out_pad * 4),
    )

    y = pl.pallas_call(
        fullycon_kernel,
        out_shape=jax.ShapeDtypeStruct((m_pad, n_out_pad), jnp.float32),
        grid=(m_pad // tm,),
        in_specs=[
            pl.BlockSpec((tm, n_in), lambda i: (i, 0)),
            pl.BlockSpec((n_in, n_out_pad), lambda i: (0, 0)),   # grid-invariant
            pl.BlockSpec((1, n_out_pad), lambda i: (0, 0)),      # grid-invariant
        ],
        out_specs=pl.BlockSpec((tm, n_out_pad), lambda i: (i, 0)),
        compiler_params=pltpu.CompilerParams(
            dimension_semantics=("parallel",)),
        cost_estimate=cost,
    )(x2d, w_t_pad, b_pad)
    return y[:m]


def fullycon_forward(x, params, out_hw):
    """Single-sample forward, exact module semantics: returns (1, 10, out_h, out_w)."""
    w_t_pad, b_pad = params
    n_in = w_t_pad.shape[0]
    out_h, out_w = out_hw
    n_out = 10 * out_h * out_w
    y = _fullycon_matmul(x.reshape(1, n_in), w_t_pad, b_pad)   # view(-1)
    return y[:, :n_out].reshape(1, 10, out_h, out_w)


def fullycon_forward_batched(x, params, out_hw):
    """Batched extension: x (M, ...) -> (M, 10, out_h, out_w), one MXU matmul."""
    w_t_pad, b_pad = params
    n_in = w_t_pad.shape[0]
    out_h, out_w = out_hw
    n_out = 10 * out_h * out_w
    m = x.shape[0]
    y = _fullycon_matmul(x.reshape(m, n_in), w_t_pad, b_pad)
    return y[:, :n_out].reshape(m, 10, out_h, out_w)


if __name__ == "__main__":
    # Small ARC-like shapes: 4x4 input grid, 3x3 output grid, 10 "colors".
    inp_h, inp_w = 4, 4
    out_h, out_w = 3, 3
    n_in = inp_h * inp_w * 10        # 160
    n_out = out_h * out_w * 10       # 90

    key = jax.random.PRNGKey(0)
    kx, kw, kb, kxb = jax.random.split(key, 4)

    # Input the module flattens with view(-1): (1, 10, h, w).
    x = jax.random.normal(kx, (1, 10, inp_h, inp_w), dtype=jnp.float32)

    # nn.Linear-style init: uniform +-1/sqrt(fan_in).
    bound = 1.0 / jnp.sqrt(jnp.float32(n_in))
    w = jax.random.uniform(kw, (n_out, n_in), jnp.float32, -bound, bound)
    b = jax.random.uniform(kb, (n_out,), jnp.float32, -bound, bound)

    # One-time init-time prep: transpose, lane-pad 90 -> 128, bf16 weights.
    params = prepare_fullycon_params(w, b, param_dtype=jnp.bfloat16)

    fwd = jax.jit(functools.partial(fullycon_forward, out_hw=(out_h, out_w)))
    out = jax.block_until_ready(fwd(x, params))
    assert out.shape == (1, 10, out_h, out_w)

    # Reference with the same stored (bf16-quantized) params and f32 accumulation
    # -- exactly the kernel's arithmetic (bf16*bf16 products are exact in f32).
    xq = x.reshape(-1).astype(jnp.bfloat16).astype(jnp.float32)
    wq = w.astype(jnp.bfloat16).astype(jnp.float32)
    ref = (xq @ wq.T + b).reshape(1, 10, out_h, out_w)
    assert jnp.allclose(out, ref, atol=2e-5, rtol=2e-5)

    # Sanity check vs. the full-f32 module forward (bf16 weight quantization only).
    ref_f32 = (x.reshape(-1) @ w.T + b).reshape(1, 10, out_h, out_w)
    assert jnp.allclose(out, ref_f32, atol=5e-2)

    # Batched path (amortizes dispatch, fills MXU rows).
    xb = jax.random.normal(kxb, (8, 10, inp_h, inp_w), dtype=jnp.float32)
    fwd_b = jax.jit(functools.partial(fullycon_forward_batched, out_hw=(out_h, out_w)))
    out_b = jax.block_until_ready(fwd_b(xb, params))
    assert out_b.shape == (8, 10, out_h, out_w)
    xbq = xb.reshape(8, -1).astype(jnp.bfloat16).astype(jnp.float32)
    ref_b = (xbq @ wq.T + b).reshape(8, 10, out_h, out_w)
    assert jnp.allclose(out_b, ref_b, atol=2e-5, rtol=2e-5)

    print("KERNEL_OK")
</pallas_src>

<mosaic_0001>
module attributes {stable_mosaic.version = 11 : i64} {
  func.func @fullycon_kernel(%arg0: i32, %arg1: memref<1x160xf32, #tpu.memory_space<vmem>>, %arg2: memref<160x128xbf16, #tpu.memory_space<vmem>>, %arg3: memref<1x128xf32, #tpu.memory_space<vmem>>, %arg4: memref<1x128xf32, #tpu.memory_space<vmem>>) attributes {dimension_semantics = [#tpu.dimension_semantics<parallel>], iteration_bounds = array<i64: 1>, scalar_prefetch = 0 : i64, scratch_operands = 0 : i64, tpu.core_type = #tpu.core_type<tc>, window_params = [{transform_indices = @transform_0, window_bounds = array<i64: 1, 160>}, {pipeline_mode = #tpu.pipeline_mode<synchronous>, transform_indices = @transform_1, window_bounds = array<i64: 160, 128>}, {pipeline_mode = #tpu.pipeline_mode<synchronous>, transform_indices = @transform_2, window_bounds = array<i64: 1, 128>}, {transform_indices = @transform_3, window_bounds = array<i64: 1, 128>}]} {
    %c0 = arith.constant 0 : index
    %c0_0 = arith.constant 0 : index
    %0 = vector.load %arg1[%c0, %c0_0] : memref<1x160xf32, #tpu.memory_space<vmem>>, vector<1x160xf32>
    %1 = arith.truncf %0 : vector<1x160xf32> to vector<1x160xbf16>
    %c0_1 = arith.constant 0 : index
    %c0_2 = arith.constant 0 : index
    %2 = vector.load %arg2[%c0_1, %c0_2] : memref<160x128xbf16, #tpu.memory_space<vmem>>, vector<160x128xbf16>
    %cst = arith.constant dense<0.000000e+00> : vector<1x128xf32>
    %3 = tpu.matmul %1, %2, %cst {dimension_numbers = #tpu.dot_dimension_numbers<[1], [0], [0], [1], [0, 0, 1, 1], [], []>} : vector<1x160xbf16>, vector<160x128xbf16>, vector<1x128xf32> -> vector<1x128xf32>
    %c0_3 = arith.constant 0 : index
    %c0_4 = arith.constant 0 : index
    %4 = vector.load %arg3[%c0_3, %c0_4] : memref<1x128xf32, #tpu.memory_space<vmem>>, vector<1x128xf32>
    %5 = arith.addf %3, %4 : vector<1x128xf32>
    %c0_5 = arith.constant 0 : index
    %c0_6 = arith.constant 0 : index
    %6 = vector.load %arg4[%c0_5, %c0_6] : memref<1x128xf32, #tpu.memory_space<vmem>>, vector<1x128xf32>
    tpu.vector_store %arg4[%c0_5, %c0_6], %5 {strides = array<i32>} : memref<1x128xf32, #tpu.memory_space<vmem>>, vector<1x128xf32>,
    return
  }
  func.func @transform_0(%arg0: i32) -> (i32, i32) {
    %c0_i32 = arith.constant 0 : i32
    %c0_i32_0 = arith.constant 0 : i32
    return %arg0, %c0_i32 : i32, i32
  }
  func.func @transform_1(%arg0: i32) -> (i32, i32) {
    %c0_i32 = arith.constant 0 : i32
    %c0_i32_0 = arith.constant 0 : i32
    %c0_i32_1 = arith.constant 0 : i32
    return %c0_i32, %c0_i32_0 : i32, i32
  }
  func.func @transform_2(%arg0: i32) -> (i32, i32) {
    %c0_i32 = arith.constant 0 : i32
    %c0_i32_0 = arith.constant 0 : i32
    %c0_i32_1 = arith.constant 0 : i32
    return %c0_i32, %c0_i32_0 : i32, i32
  }
  func.func @transform_3(%arg0: i32) -> (i32, i32) {
    %c0_i32 = arith.constant 0 : i32
    %c0_i32_0 = arith.constant 0 : i32
    return %arg0, %c0_i32 : i32, i32
  }
}

</mosaic_0001>

<bundles_post_ra>
// kernel: fullycon_forward.1
= control target key start
LH: loop header
LB: loop body
LE: loop exit
PB: predicated region body
PF: predicated region fallthrough
CT: control target
= control target key end

     0   :  { %v17_v0 = vlaneseq  ;;  %v181_v1 = vmov 0   ;;  %vm110_vm0 = vcmask 261120   ;;  %s241_s1 = inlined_call_operand.vmem [shape: bf16[160,128], index: 1, kind: input, shape index: {}]   ;;  %s242_s0 = inlined_call_operand.vmem [shape: f32[1,160], index: 0, kind: input, shape index: {}]   ;;  %s243_s2 = inlined_call_operand.vmem [shape: f32[1,128], index: 2, kind: input, shape index: {}]   ;;  %s244_s3 = inlined_call_operand.vmem [shape: f32[1,128], index: 3, kind: output, shape index: {}]  }
   0x1   :  { %114 = vmatprep.subr.bf16.mxu0 %v181_v1  ;;  %v171_v2 = vld [vmem:[%s241_s1 + $0x38] sm:$0xff]   ;;  %v172_v3 = vld [vmem:[%s241_s1 + $0x30] sm:$0xff]   ;;  %v173_v5 = vld [vmem:[%s241_s1 + $0x28] sm:$0xff]  }
   0x2   :  { %115 = vmatpush1.bf16.msra.mxu0 %v171_v2  ;;  %v18_v4 = vshrl.u32 %v17_v0, 7  ;;  %v174_v7 = vld [vmem:[%s241_s1 + $0x20] sm:$0xff]   ;;  %v175_v11 = vld [vmem:[%s241_s1 + $0x18] sm:$0xff]   ;;  %v176_v12 = vld [vmem:[%s241_s1 + $0x10] sm:$0xff]  }
   0x3   :  { %116 = vmatprep.subr.bf16.mxu0 %v181_v1  ;;  %v15_v8 = vld [vmem:[%s242_s0] sm:$0x3]  ;;  %v177_v13 = vld [vmem:[%s241_s1 + $0x8] sm:$0xff]  }
   0x4   :  { %v23_v6 = vsub.s32 1, %v18_v4  ;;  %v178_v14 = vld [vmem:[%s241_s1] sm:$0xff]   ;;  %v19_v15 = vsub.s32 0, %v18_v4  ;;  %v179_v16 = vld [vmem:[%s241_s1 + $0x48] sm:$0xff]  }
   0x5   :  { %v180_v18 = vld [vmem:[%s241_s1 + $0x40] sm:$0xff]  }
   0x6   :  { %117 = vmatpush1.bf16.msra.mxu0 %v172_v3  ;;  %v24_v9 = vrot.slane %v15_v8, %v23_v6  ;;  %v20_v17 = vrot.slane %v15_v8, %v19_v15  ;;  %v49_v20 = vld [vmem:[%s243_s2] sm:$0x1] }
   0x7   :  { %118 = vmatprep.subr.bf16.mxu0 %v181_v1 }
   0x8   :  { %v28_v10 = vpack.c.bf16 %v24_v9, %v24_v9  ;;  %v27_v19 = vpack.c.bf16 %v20_v17, %v20_v17 }
   0xa   :  { %119 = vmatpush1.bf16.msra.mxu0 %v173_v5  ;;  %169 = vmatprep.mubr.msk.bf16.mxu0 %vm110_vm0, %v28_v10 }
   0xb   :  { %120 = vmatprep.subr.bf16.mxu0 %v181_v1 }
   0xe   :  { %121 = vmatpush1.bf16.msra.mxu0 %v174_v7 }
   0xf   :  { %122 = vmatprep.subr.bf16.mxu0 %v181_v1 }
  0x12   :  { %123 = vmatpush1.bf16.msra.mxu0 %v175_v11 }
  0x13   :  { %124 = vmatprep.subr.bf16.mxu0 %v181_v1 }
  0x16   :  { %125 = vmatpush1.bf16.msra.mxu0 %v176_v12 }
  0x17   :  { %126 = vmatprep.subr.bf16.mxu0 %v181_v1 }
  0x1a   :  { %127 = vmatpush1.bf16.msra.mxu0 %v177_v13 }
  0x1b   :  { %128 = vmatprep.subr.bf16.mxu0 %v181_v1 }
  0x1e   :  { %129 = vmatpush1.bf16.msra.mxu0 %v178_v14 }
  0x1f   :  { %142 = vmatprep.subr.bf16.mxu0 %v181_v1 }
  0x22   :  { %143 = vmatpush2.bf16.msra.mxu0 %v179_v16 }
  0x23   :  { %144 = vmatprep.subr.bf16.mxu0 %v181_v1 }
  0x26   :  { %145 = vmatpush2.bf16.msra.mxu0 %v180_v18 }
  0x29   :  { %147 = vmatmul.mubr.bf16.vlgmr.msra.gmra.mxu0 %v27_v19 }
  0xe9   :  { %v148_v21 = vpop.f32.mrf.mxu0 }
  0xea   :  { %v149_v22 = vadd.f32 %v148_v21, %v49_v20 }
  0xeb   :  { %v150_v23 = vpop.f32.mrf.mxu0 }
  0xec   :  { %154 = vst [vmem:[%s244_s3] sm:$0x1] %v149_v22 }
  0xed   :  { %v151_v24 = vpop.f32.mrf.mxu0 }
  0xef   :  { %v152_v25 = vpop.f32.mrf.mxu0 }

</bundles_post_ra>
